<compile_context>
chip_gen: v7x
topology: tpu7x:2x2x1
jax: 0.10.0
libtpu: 0.0.40
codegen_flags: <defaults>
</compile_context>

<pallas_src>
import numpy as np
import jax
import jax.numpy as jnp
from jax.experimental import pallas as pl
from jax.experimental.pallas import tpu as pltpu


# ----------------------------------------------------------------------------
# Fixed SRM filter bank (non-learnable constants of SRMConv2d_simple).
# ----------------------------------------------------------------------------
def _build_srm_filters() -> np.ndarray:
    filter1 = np.asarray([[0, 0, 0, 0, 0],
                          [0, -1, 2, -1, 0],
                          [0, 2, -4, 2, 0],
                          [0, -1, 2, -1, 0],
                          [0, 0, 0, 0, 0]], dtype=float) / 4.0
    filter2 = np.asarray([[-1, 2, -2, 2, -1],
                          [2, -6, 8, -6, 2],
                          [-2, 8, -12, 8, -2],
                          [2, -6, 8, -6, 2],
                          [-1, 2, -2, 2, -1]], dtype=float) / 12.0
    filter3 = np.asarray([[0, 0, 0, 0, 0],
                          [0, 0, 0, 0, 0],
                          [0, 1, -2, 1, 0],
                          [0, 0, 0, 0, 0],
                          [0, 0, 0, 0, 0]], dtype=float) / 2.0
    return np.stack([filter1, filter2, filter3]).astype(np.float32)


_SRM_FILTERS = _build_srm_filters()          # (3, 5, 5) fixed constants
_NUM_OUT = 3


def _build_srm_kernel(inc: int) -> np.ndarray:
    """Full (3, inc, 5, 5) bank, identical to SRMConv2d_simple._build_kernel."""
    return np.repeat(_SRM_FILTERS[:, None, :, :], inc, axis=1).astype(np.float32)


# ----------------------------------------------------------------------------
# Trace-time verification of the grouped/shared-tap decomposition baked into
# the kernel.  Per image the kernel computes (S0 = channel-summed padded plane,
# Sd = S0 shifted by d columns):
#     E1  = S(-2) + S(+2)        E2  = S(-1) + S(+1)        (XLU roll pairs)
#     B   = 2*S0 - E2        -> filter1 rows 1,3 (x4); -2*B -> row 2; -B -> filter3 (x2)
#     A12 = 2*E2 - E1 - 2*S0 -> filter2 rows 0,4 (x12)
#     C12 = 2*E1 - 6*E2 + 8*S0 -> filter2 rows 1,3 (x12)
#     D12 = -2*(A12 + C12)   -> filter2 row 2 (x12)
# followed by a 5-row vertical combination.  This relies on (a) the bank being
# np.repeat'ed across input channels (so channels can be pre-summed) and
# (b) every filter being left/right symmetric (only +/-shift sums are needed,
# which also makes the math independent of the roll sign convention).
_cS0 = np.array([0., 0., 1., 0., 0.])
_cE1 = np.array([1., 0., 0., 0., 1.])
_cE2 = np.array([0., 1., 0., 1., 0.])
_cB = 2 * _cS0 - _cE2
_cA = 2 * _cE2 - _cE1 - 2 * _cS0
_cC = 2 * _cE1 - 6 * _cE2 + 8 * _cS0
_cD = -2 * (_cA + _cC)
_z = np.zeros(5)
assert np.array_equal(_SRM_FILTERS, _SRM_FILTERS[:, :, ::-1]), "filters must be L/R symmetric"
assert np.allclose(4.0 * _SRM_FILTERS[0], np.stack([_z, _cB, -2 * _cB, _cB, _z]))
assert np.allclose(12.0 * _SRM_FILTERS[1], np.stack([_cA, _cC, _cD, _cC, _cA]))
assert np.allclose(2.0 * _SRM_FILTERS[2], np.stack([_z, _z, -_cB, _z, _z]))


def _round_up(v: int, m: int) -> int:
    return ((v + m - 1) // m) * m


def _srm_conv_kernel(x_ref, o_ref, plane_ref):
    # x_ref:     (1, C, H, W)   VMEM  unpadded input block for one image
    # o_ref:     (1, 3, H, W)   VMEM
    # plane_ref: (H + 4, Wp)    VMEM  padded, channel-summed plane (Wp % 128 == 0)
    H, W = o_ref.shape[2], o_ref.shape[3]
    Wp = plane_ref.shape[1]

    # 1) Zero only the halo strips the stencil actually reads (top/bottom 2
    #    rows, the 2 columns right of the image, and the 2 last columns the
    #    circular rolls wrap to for the left halo).  Re-done every grid step
    #    so it stays correct when the batch axis is split across cores.
    plane_ref[pl.ds(0, 2), pl.ds(0, Wp)] = jnp.zeros((2, Wp), jnp.float32)
    plane_ref[pl.ds(H + 2, 2), pl.ds(0, Wp)] = jnp.zeros((2, Wp), jnp.float32)
    plane_ref[pl.ds(2, H), pl.ds(W, 2)] = jnp.zeros((H, 2), jnp.float32)
    plane_ref[pl.ds(2, H), pl.ds(Wp - 2, 2)] = jnp.zeros((H, 2), jnp.float32)

    # 2) Channel pre-sum (valid because the SRM bank repeats the same 5x5
    #    filter across input channels; see _build_srm_kernel / asserts above).
    #    Image occupies rows [2, H+2), cols [0, W) -> interior store at lane 0.
    x_sum = jnp.sum(x_ref[0].astype(jnp.float32), axis=0)        # (H, W)
    plane_ref[pl.ds(2, H), pl.ds(0, W)] = x_sum

    p = plane_ref[...]                                           # (H+4, Wp)

    # 3) Horizontal (lane) combinations via 4 XLU rolls; left halo comes from
    #    the wrap into the zeroed last two columns.  Only the +/-1 and +/-2
    #    shift *sums* are needed (filters are left/right symmetric).
    e1 = pltpu.roll(p, 2, 1) + pltpu.roll(p, Wp - 2, 1)          # S(-2)+S(+2)
    e2 = pltpu.roll(p, 1, 1) + pltpu.roll(p, Wp - 1, 1)          # S(-1)+S(+1)
    s0x2 = p + p                                                 # 2*S0
    b = s0x2 - e2                                                # [-1, 2, -1] row conv
    a12 = e2 + e2 - e1 - s0x2                                    # filter2 rows 0,4 (x12)
    c12 = 2.0 * e1 - 6.0 * e2 + 4.0 * s0x2                       # filter2 rows 1,3 (x12)
    d12 = -2.0 * (a12 + c12)                                     # filter2 row 2  (x12)

    # 4) Vertical combination: window row dy = rows [dy, dy+H) of the combos.
    def rows(v, dy):
        return v[dy:dy + H, :]

    out1 = (rows(b, 1) + rows(b, 3) - 2.0 * rows(b, 2)) * 0.25
    out2 = (rows(a12, 0) + rows(a12, 4)
            + rows(c12, 1) + rows(c12, 3)
            + rows(d12, 2)) * (1.0 / 12.0)
    out3 = rows(b, 2) * (-0.5)

    # 5) Drop lane padding, Hardtanh(-3, 3), store.
    o_ref[0, 0] = jnp.clip(out1[:, :W], -3.0, 3.0).astype(o_ref.dtype)
    o_ref[0, 1] = jnp.clip(out2[:, :W], -3.0, 3.0).astype(o_ref.dtype)
    o_ref[0, 2] = jnp.clip(out3[:, :W], -3.0, 3.0).astype(o_ref.dtype)


def srm_conv2d_simple(x: jax.Array) -> jax.Array:
    """x: (N, C, H, W) -> (N, 3, H, W), matching SRMConv2d_simple.forward."""
    N, C, H, W = x.shape
    Wp = _round_up(W + 4, 128)                  # lane-dense padded plane width

    # VMEM budget: double-buffered in/out blocks + the padded plane (+ slack).
    block_bytes = 4 * (2 * C * H * W + 2 * _NUM_OUT * H * W + (H + 4) * Wp)
    vmem_limit = min(max(2 * block_bytes, 8 * 1024 * 1024), 64 * 1024 * 1024)

    cost = pl.CostEstimate(
        flops=2 * 37 * N * H * W + (C - 1) * N * H * W,   # nonzero taps + channel pre-sum
        transcendentals=0,
        bytes_accessed=4 * N * H * W * (C + _NUM_OUT),
    )

    # TODO(synk): for large images (e.g. >=1k x 1k on v7x's 64 MiB VMEM) add a
    # second "parallel" grid axis over row tiles with a 4-row halo and sub-tile
    # the stencil to bound vreg pressure; whole-image blocks are ideal here.
    return pl.pallas_call(
        _srm_conv_kernel,
        out_shape=jax.ShapeDtypeStruct((N, _NUM_OUT, H, W), x.dtype),
        grid=(N,),
        in_specs=[pl.BlockSpec((1, C, H, W), lambda n: (n, 0, 0, 0))],
        out_specs=pl.BlockSpec((1, _NUM_OUT, H, W), lambda n: (n, 0, 0, 0)),
        scratch_shapes=[pltpu.VMEM((H + 4, Wp), jnp.float32)],
        compiler_params=pltpu.CompilerParams(
            dimension_semantics=("parallel",),
            vmem_limit_bytes=vmem_limit),
        cost_estimate=cost,
    )(x)


def _reference(x: jax.Array, weight: jax.Array) -> jax.Array:
    out = jax.lax.conv_general_dilated(
        x, weight,
        window_strides=(1, 1),
        padding=((2, 2), (2, 2)),
        dimension_numbers=("NCHW", "OIHW", "NCHW"),
        precision=jax.lax.Precision.HIGHEST,
    )
    return jnp.clip(out, -3.0, 3.0)


if __name__ == "__main__":
    inc = 3
    N, H, W = 2, 16, 16
    key = jax.random.PRNGKey(0)
    x = jax.random.normal(key, (N, inc, H, W), dtype=jnp.float32) * 2.0

    out = jax.block_until_ready(srm_conv2d_simple(x))

    ref = _reference(x, jnp.asarray(_build_srm_kernel(inc)))
    assert out.shape == (N, _NUM_OUT, H, W)
    np.testing.assert_allclose(np.asarray(out), np.asarray(ref),
                               rtol=1e-5, atol=1e-4)
    print("KERNEL_OK")
</pallas_src>

<mosaic_0001>
module attributes {stable_mosaic.version = 11 : i64} {
  func.func @_srm_conv_kernel(%arg0: i32, %arg1: memref<1x3x16x16xf32, #tpu.memory_space<vmem>>, %arg2: memref<1x3x16x16xf32, #tpu.memory_space<vmem>>, %arg3: memref<20x128xf32, #tpu.memory_space<vmem>>) attributes {dimension_semantics = [#tpu.dimension_semantics<parallel>], iteration_bounds = array<i64: 2>, scalar_prefetch = 0 : i64, scratch_operands = 1 : i64, tpu.core_type = #tpu.core_type<tc>, window_params = [{transform_indices = @transform_0, window_bounds = array<i64: 1, 3, 16, 16>}, {transform_indices = @transform_1, window_bounds = array<i64: 1, 3, 16, 16>}]} {
    %cst = arith.constant 0.000000e+00 : f32
    %0 = vector.broadcast %cst : f32 to vector<2x128xf32>
    %c0 = arith.constant 0 : index
    %c0_0 = arith.constant 0 : index
    %1 = vector.load %arg3[%c0, %c0_0] : memref<20x128xf32, #tpu.memory_space<vmem>>, vector<2x128xf32>
    tpu.vector_store %arg3[%c0, %c0_0], %0 {strides = array<i32>} : memref<20x128xf32, #tpu.memory_space<vmem>>, vector<2x128xf32>,
    %cst_1 = arith.constant 0.000000e+00 : f32
    %2 = vector.broadcast %cst_1 : f32 to vector<2x128xf32>
    %c18 = arith.constant 18 : index
    %c0_2 = arith.constant 0 : index
    %3 = vector.load %arg3[%c18, %c0_2] : memref<20x128xf32, #tpu.memory_space<vmem>>, vector<2x128xf32>
    tpu.vector_store %arg3[%c18, %c0_2], %2 {strides = array<i32>} : memref<20x128xf32, #tpu.memory_space<vmem>>, vector<2x128xf32>,
    %cst_3 = arith.constant 0.000000e+00 : f32
    %4 = vector.broadcast %cst_3 : f32 to vector<16x2xf32>
    %c2 = arith.constant 2 : index
    %c16 = arith.constant 16 : index
    %5 = vector.load %arg3[%c2, %c16] : memref<20x128xf32, #tpu.memory_space<vmem>>, vector<16x2xf32>
    tpu.vector_store %arg3[%c2, %c16], %4 {strides = array<i32>} : memref<20x128xf32, #tpu.memory_space<vmem>>, vector<16x2xf32>,
    %cst_4 = arith.constant 0.000000e+00 : f32
    %6 = vector.broadcast %cst_4 : f32 to vector<16x2xf32>
    %c2_5 = arith.constant 2 : index
    %c126 = arith.constant 126 : index
    %7 = vector.load %arg3[%c2_5, %c126] : memref<20x128xf32, #tpu.memory_space<vmem>>, vector<16x2xf32>
    tpu.vector_store %arg3[%c2_5, %c126], %6 {strides = array<i32>} : memref<20x128xf32, #tpu.memory_space<vmem>>, vector<16x2xf32>,
    %c0_6 = arith.constant 0 : index
    %c0_7 = arith.constant 0 : index
    %c0_8 = arith.constant 0 : index
    %c0_9 = arith.constant 0 : index
    %8 = vector.load %arg1[%c0_6, %c0_7, %c0_8, %c0_9] : memref<1x3x16x16xf32, #tpu.memory_space<vmem>>, vector<1x3x16x16xf32>
    %9 = vector.shape_cast %8 : vector<1x3x16x16xf32> to vector<3x16x16xf32>
    %cst_10 = arith.constant dense<0.000000e+00> : vector<16x16xf32>
    %10 = vector.multi_reduction <add>, %9, %cst_10 [0] : vector<3x16x16xf32> to vector<16x16xf32>
    %c2_11 = arith.constant 2 : index
    %c0_12 = arith.constant 0 : index
    %11 = vector.load %arg3[%c2_11, %c0_12] : memref<20x128xf32, #tpu.memory_space<vmem>>, vector<16x16xf32>
    tpu.vector_store %arg3[%c2_11, %c0_12], %10 {strides = array<i32>} : memref<20x128xf32, #tpu.memory_space<vmem>>, vector<16x16xf32>,
    %c0_13 = arith.constant 0 : index
    %c0_14 = arith.constant 0 : index
    %12 = vector.load %arg3[%c0_13, %c0_14] : memref<20x128xf32, #tpu.memory_space<vmem>>, vector<20x128xf32>
    %c2_i32 = arith.constant 2 : i32
    %13 = tpu.dynamic_rotate %12 by %c2_i32 dim 1 : vector<20x128xf32>, i32 -> vector<20x128xf32>
    %c126_i32 = arith.constant 126 : i32
    %14 = tpu.dynamic_rotate %12 by %c126_i32 dim 1 : vector<20x128xf32>, i32 -> vector<20x128xf32>
    %15 = arith.addf %13, %14 : vector<20x128xf32>
    %c1_i32 = arith.constant 1 : i32
    %16 = tpu.dynamic_rotate %12 by %c1_i32 dim 1 : vector<20x128xf32>, i32 -> vector<20x128xf32>
    %c127_i32 = arith.constant 127 : i32
    %17 = tpu.dynamic_rotate %12 by %c127_i32 dim 1 : vector<20x128xf32>, i32 -> vector<20x128xf32>
    %18 = arith.addf %16, %17 : vector<20x128xf32>
    %19 = arith.addf %12, %12 : vector<20x128xf32>
    %20 = arith.subf %19, %18 : vector<20x128xf32>
    %21 = arith.addf %18, %18 : vector<20x128xf32>
    %22 = arith.subf %21, %15 : vector<20x128xf32>
    %23 = arith.subf %22, %19 : vector<20x128xf32>
    %cst_15 = arith.constant 2.000000e+00 : f32
    %24 = vector.broadcast %cst_15 : f32 to vector<20x128xf32>
    %25 = arith.mulf %24, %15 : vector<20x128xf32>
    %cst_16 = arith.constant 6.000000e+00 : f32
    %26 = vector.broadcast %cst_16 : f32 to vector<20x128xf32>
    %27 = arith.mulf %26, %18 : vector<20x128xf32>
    %28 = arith.subf %25, %27 : vector<20x128xf32>
    %cst_17 = arith.constant 4.000000e+00 : f32
    %29 = vector.broadcast %cst_17 : f32 to vector<20x128xf32>
    %30 = arith.mulf %29, %19 : vector<20x128xf32>
    %31 = arith.addf %28, %30 : vector<20x128xf32>
    %32 = arith.addf %23, %31 : vector<20x128xf32>
    %cst_18 = arith.constant -2.000000e+00 : f32
    %33 = vector.broadcast %cst_18 : f32 to vector<20x128xf32>
    %34 = arith.mulf %33, %32 : vector<20x128xf32>
    %35 = vector.extract_strided_slice %20 {offsets = [1, 0], sizes = [16, 128], strides = [1, 1]} : vector<20x128xf32> to vector<16x128xf32>
    %36 = vector.extract_strided_slice %20 {offsets = [3, 0], sizes = [16, 128], strides = [1, 1]} : vector<20x128xf32> to vector<16x128xf32>
    %37 = arith.addf %35, %36 : vector<16x128xf32>
    %38 = vector.extract_strided_slice %20 {offsets = [2, 0], sizes = [16, 128], strides = [1, 1]} : vector<20x128xf32> to vector<16x128xf32>
    %cst_19 = arith.constant 2.000000e+00 : f32
    %39 = vector.broadcast %cst_19 : f32 to vector<16x128xf32>
    %40 = arith.mulf %39, %38 : vector<16x128xf32>
    %41 = arith.subf %37, %40 : vector<16x128xf32>
    %cst_20 = arith.constant 2.500000e-01 : f32
    %42 = vector.broadcast %cst_20 : f32 to vector<16x128xf32>
    %43 = arith.mulf %41, %42 : vector<16x128xf32>
    %44 = vector.extract_strided_slice %23 {offsets = [0, 0], sizes = [16, 128], strides = [1, 1]} : vector<20x128xf32> to vector<16x128xf32>
    %45 = vector.extract_strided_slice %23 {offsets = [4, 0], sizes = [16, 128], strides = [1, 1]} : vector<20x128xf32> to vector<16x128xf32>
    %46 = arith.addf %44, %45 : vector<16x128xf32>
    %47 = vector.extract_strided_slice %31 {offsets = [1, 0], sizes = [16, 128], strides = [1, 1]} : vector<20x128xf32> to vector<16x128xf32>
    %48 = arith.addf %46, %47 : vector<16x128xf32>
    %49 = vector.extract_strided_slice %31 {offsets = [3, 0], sizes = [16, 128], strides = [1, 1]} : vector<20x128xf32> to vector<16x128xf32>
    %50 = arith.addf %48, %49 : vector<16x128xf32>
    %51 = vector.extract_strided_slice %34 {offsets = [2, 0], sizes = [16, 128], strides = [1, 1]} : vector<20x128xf32> to vector<16x128xf32>
    %52 = arith.addf %50, %51 : vector<16x128xf32>
    %cst_21 = arith.constant 0.0833333358 : f32
    %53 = vector.broadcast %cst_21 : f32 to vector<16x128xf32>
    %54 = arith.mulf %52, %53 : vector<16x128xf32>
    %55 = vector.extract_strided_slice %20 {offsets = [2, 0], sizes = [16, 128], strides = [1, 1]} : vector<20x128xf32> to vector<16x128xf32>
    %cst_22 = arith.constant -5.000000e-01 : f32
    %56 = vector.broadcast %cst_22 : f32 to vector<16x128xf32>
    %57 = arith.mulf %55, %56 : vector<16x128xf32>
    %58 = vector.extract_strided_slice %43 {offsets = [0, 0], sizes = [16, 16], strides = [1, 1]} : vector<16x128xf32> to vector<16x16xf32>
    %cst_23 = arith.constant -3.000000e+00 : f32
    %cst_24 = arith.constant 3.000000e+00 : f32
    %59 = vector.broadcast %cst_23 : f32 to vector<16x16xf32>
    %60 = arith.maximumf %59, %58 : vector<16x16xf32>
    %61 = vector.broadcast %cst_24 : f32 to vector<16x16xf32>
    %62 = arith.minimumf %61, %60 : vector<16x16xf32>
    %c0_25 = arith.constant 0 : index
    %c0_26 = arith.constant 0 : index
    %c0_27 = arith.constant 0 : index
    %c0_28 = arith.constant 0 : index
    %63 = vector.load %arg2[%c0_25, %c0_26, %c0_27, %c0_28] : memref<1x3x16x16xf32, #tpu.memory_space<vmem>>, vector<1x1x16x16xf32>
    %64 = vector.shape_cast %63 : vector<1x1x16x16xf32> to vector<16x16xf32>
    %65 = vector.shape_cast %62 : vector<16x16xf32> to vector<1x1x16x16xf32>
    tpu.vector_store %arg2[%c0_25, %c0_26, %c0_27, %c0_28], %65 {strides = array<i32>} : memref<1x3x16x16xf32, #tpu.memory_space<vmem>>, vector<1x1x16x16xf32>,
    %66 = vector.extract_strided_slice %54 {offsets = [0, 0], sizes = [16, 16], strides = [1, 1]} : vector<16x128xf32> to vector<16x16xf32>
    %cst_29 = arith.constant -3.000000e+00 : f32
    %cst_30 = arith.constant 3.000000e+00 : f32
    %67 = vector.broadcast %cst_29 : f32 to vector<16x16xf32>
    %68 = arith.maximumf %67, %66 : vector<16x16xf32>
    %69 = vector.broadcast %cst_30 : f32 to vector<16x16xf32>
    %70 = arith.minimumf %69, %68 : vector<16x16xf32>
    %c0_31 = arith.constant 0 : index
    %c1 = arith.constant 1 : index
    %c0_32 = arith.constant 0 : index
    %c0_33 = arith.constant 0 : index
    %71 = vector.load %arg2[%c0_31, %c1, %c0_32, %c0_33] : memref<1x3x16x16xf32, #tpu.memory_space<vmem>>, vector<1x1x16x16xf32>
    %72 = vector.shape_cast %71 : vector<1x1x16x16xf32> to vector<16x16xf32>
    %73 = vector.shape_cast %70 : vector<16x16xf32> to vector<1x1x16x16xf32>
    tpu.vector_store %arg2[%c0_31, %c1, %c0_32, %c0_33], %73 {strides = array<i32>} : memref<1x3x16x16xf32, #tpu.memory_space<vmem>>, vector<1x1x16x16xf32>,
    %74 = vector.extract_strided_slice %57 {offsets = [0, 0], sizes = [16, 16], strides = [1, 1]} : vector<16x128xf32> to vector<16x16xf32>
    %cst_34 = arith.constant -3.000000e+00 : f32
    %cst_35 = arith.constant 3.000000e+00 : f32
    %75 = vector.broadcast %cst_34 : f32 to vector<16x16xf32>
    %76 = arith.maximumf %75, %74 : vector<16x16xf32>
    %77 = vector.broadcast %cst_35 : f32 to vector<16x16xf32>
    %78 = arith.minimumf %77, %76 : vector<16x16xf32>
    %c0_36 = arith.constant 0 : index
    %c2_37 = arith.constant 2 : index
    %c0_38 = arith.constant 0 : index
    %c0_39 = arith.constant 0 : index
    %79 = vector.load %arg2[%c0_36, %c2_37, %c0_38, %c0_39] : memref<1x3x16x16xf32, #tpu.memory_space<vmem>>, vector<1x1x16x16xf32>
    %80 = vector.shape_cast %79 : vector<1x1x16x16xf32> to vector<16x16xf32>
    %81 = vector.shape_cast %78 : vector<16x16xf32> to vector<1x1x16x16xf32>
    tpu.vector_store %arg2[%c0_36, %c2_37, %c0_38, %c0_39], %81 {strides = array<i32>} : memref<1x3x16x16xf32, #tpu.memory_space<vmem>>, vector<1x1x16x16xf32>,
    return
  }
  func.func @transform_0(%arg0: i32) -> (i32, i32, i32, i32) {
    %c0_i32 = arith.constant 0 : i32
    %c0_i32_0 = arith.constant 0 : i32
    %c0_i32_1 = arith.constant 0 : i32
    %c0_i32_2 = arith.constant 0 : i32
    return %arg0, %c0_i32, %c0_i32_0, %c0_i32_1 : i32, i32, i32, i32
  }
  func.func @transform_1(%arg0: i32) -> (i32, i32, i32, i32) {
    %c0_i32 = arith.constant 0 : i32
    %c0_i32_0 = arith.constant 0 : i32
    %c0_i32_1 = arith.constant 0 : i32
    %c0_i32_2 = arith.constant 0 : i32
    return %arg0, %c0_i32, %c0_i32_0, %c0_i32_1 : i32, i32, i32, i32
  }
}

</mosaic_0001>

<bundles_post_ra>
// kernel: tpu_custom_call.1
= control target key start
LH: loop header
LB: loop body
LE: loop exit
PB: predicated region body
PF: predicated region fallthrough
CT: control target
= control target key end

     0   :  { %6 = vsyncpa [#allocation4], 0  ;;  %s858_s0 = inlined_call_operand.hbm [shape: f32[2,3,16,16], index: 0, kind: input, shape index: {}]   ;;  %s859_s1 = inlined_call_operand.hbm [shape: f32[2,3,16,16], index: 1, kind: output, shape index: {}]  }
   0x1   :  { %8 = vsyncpa [#allocation4 + $0x1], 0 }
   0x2   :  { %9 = vsyncpa [#allocation5], 0 }
   0x3   :  { %11 = vsyncpa [#allocation5 + $0x1], 0  ;;  %s635_s6 = smov 0   ;;  %s637_s7 = smov 0  }
   0x4   :  { %s639_s8 = smov 0   ;;  %s641_s9 = smov 0  }
   0x5 LB: > { %s656_s10 = sadd.s32 4294967295, %s612_s9   ;;  %s436_s11 = sadd.s32 4294967294, %s612_s9   ;;  %s612_s9 = sphi %s641_s9, %s871_s9   ;;  %s608_s8 = sphi %s639_s8, %s870_s8   ;;  %s604_s7 = sphi %s637_s7, %s869_s7   ;;  %s600_s6 = sphi %s635_s6, %s868_s6  }
   0x6   : > { %s660_s12 = sadd.s32 1, %s612_s9   ;;  %s24_s13 = sadd.s32 1, %s608_s8 }
   0x7   : > { %s21_s14 = ssub.s32 %s612_s9, %s660_s12  ;;  %p31_p0 = scmp.ne.s32.totalorder %s608_s8, %s604_s7 }
   0x8   : > { %p22_p1 = scmp.eq.s32.totalorder %s21_s14, 0  ;;  %p32_p2 = scmp.eq.s32.totalorder %s612_s9, 0 }
   0x9   : > { %p37_p3 = scmp.ne.s32.totalorder %s604_s7, %s600_s6  ;;  %p38_p4 = scmp.eq.s32.totalorder %s656_s10, 0 }
   0xa   : > { %s672_s15 = scalar_select %p22_p1, %s608_s8, %s24_s13  }
   0xb   : > { %p33_p5 = por %p32_p2, %p31_p0  ;;  %p674_p6 = por %p38_p4, %p37_p3 }
   0xc   : > { %p61_p7 = scmp.eq.s32.totalorder %s656_s10, 1  ;;  %p67_p8 = scmp.eq.s32.totalorder %s436_s11, 1 }
   0xd   : > { %p473_p10 = scmp.lt.s32.totalorder %s612_s9, 2  ;;  %s87_s19 = sand.u32 1, %s608_s8  }
   0xe   : > { %p681_p11 = por %p61_p7, %p31_p0  ;;  %p685_p12 = por %p67_p8, %p37_p3 }
   0xf   : > { %s458_s20 = smul.u32 768, %s612_s9  ;;  %p696_p13 = pnand %p473_p10, %p33_p5 }
  0x10   : > { %s862_s17 = scalar_select %p681_p11, 1, 0 }
  0x11   : > { %s863_s18 = scalar_select %p685_p12, 1, 0 }
  0x12   : > { %s457_s21 = smul.u32 48, %s87_s19  ;;  %s694_s24 = scalar_lea.hbm %s858_s0, %s458_s20 }
  0x13   : > { %s702_s28 = scalar_lea.sflag [#allocation4], %s87_s19  ;;  %s516_s29 = scalar_lea.hbm %s694_s24, 768 }
  0x14   : > { %s91_s26 = scalar_lea.vmem [#allocation3], %s457_s21  ;;  %p517_p0 = scmp.ne.s32.totalorder %s694_s24, %s516_s29 }
  0x15   : > { %s98_s27 = sshll.u32 %s91_s26, 4  ;;  %p518_p1 = pneg %p696_p13  ;;  %s700_s27 = int_to_ptr.vmem [resolvable:$true] %s98_s27 }
  0x16   : > { %s521_s3 = scalar_lea.hbm %s858_s0, 1536  ;;  %p522_p4 = scmp.lt.u32.totalorder %s694_s24, %s858_s0 }
  0x17   : > { %p519_p2 = pnand %p518_p1, %p517_p0  ;;  %p523_p5 = scmp.lt.u32.totalorder %s521_s3, %s516_s29 }
  0x18   : > { %p525_p8 = scmp.lt.u32.totalorder %s516_s29, %s694_s24 }
  0x19   : > { %p520_p3 = pneg %p519_p2  ;;  %p524_p7 = por %p523_p5, %p522_p4 }
  0x1b   : > { %p526_p10 = por %p525_p8, %p524_p7 }
  0x1d   : > { %p527_p9 = pnand %p526_p10, %p520_p3 }
  0x1f   : > { %530 = shalt.err (!%p527_p9)
}
  0x20   : > { %s531_s11 = scalar_lea.vmem %s700_s27, 768  ;;  %s614_s13 = smov [#allocation3]  }
  0x21   : > { %p532_p0 = scmp.ne.s32.totalorder %s700_s27, %s531_s11  ;;  %s536_s14 = sshll.u32 %s614_s13, 4  ;;  %s537_s14 = int_to_ptr.vmem [resolvable:$false] %s536_s14 }
  0x22   : > { %s538_s19 = scalar_lea.vmem %s537_s14, 1536  ;;  %p539_p11 = scmp.lt.s32.totalorder %s700_s27, %s537_s14 }
  0x23   : > { %p534_p2 = pnand %p532_p0, %p518_p1  ;;  %p540_p4 = scmp.lt.s32.totalorder %s538_s19, %s531_s11 }
  0x25   : > { %p535_p12 = pneg %p534_p2  ;;  %p541_p5 = por %p540_p4, %p539_p11 }
  0x27   : > { %p542_p7 = pnand %p541_p5, %p535_p12 }
  0x29   : > { %545 = shalt.err (!%p542_p7)
}
  0x2a   : > { %s615_s20 = smov 128   ;;  %s616_s21 = smov 8  }
  0x2b   : > { %468 = dma.hbm_to_vmem [thread:$0]  (!%p696_p13), %s694_s24, 768, %s700_s27, %s702_s28, %s615_s20, %s615_s20, %s616_s21  }
  0x2c   : > { %p440_p9 = scmp.ge.s32.totalorder %s612_s9, 1  ;;  %p106_p1 = scmp.lt.s32.totalorder %s612_s9, 3 }
  0x2e   : > { %p107_p3 = pnand %p440_p9, %p106_p1 }
  0x2f   : > { %s733_s22 = sand.u32 (!%p107_p3), 1, %s604_s7  }
  0x30   : > { %110 = sbr.rel (%p107_p3) target bundleno = 245 (0xf5), region = 24  ;;  %s113_s26 = scalar_lea.sflag (!%p107_p3), [#allocation4], %s733_s22 }
  0x31   : > { %s459_s23 = smul.u32 (!%p107_p3), 48, %s733_s22 }
  0x33   : > { %s116_s29 = scalar_lea.vmem (!%p107_p3), [#allocation3], %s459_s23 }
  0x37   : > { %591 = dma.done.wait (%p674_p6), %s113_s26, 768  }
  0x38   : > { %593 = vsyncadd (%p674_p6), %s113_s26, 4294966528  ;;  %vm137_vm0 = vcmask 146560   ;;  %vm140_vm1 = vcmask 1048560   ;;  %v617_v0 = vmov 0.0   ;;  %vm149_vm2 = vcmask 130048   ;;  %v144_v1 = vld [vmem:[%s116_s29 + $0x8] sm:$0xff] }
  0x39   : > { %136 = vst [vmem:[#allocation2 + $0x12] sm:$0x3] %v617_v0  ;;  %139 = vst.msk [vmem:[#allocation2 + $0xa] sm:$0xff] %vm137_vm0, %v617_v0  ;;  %v146_v2 = vld [vmem:[%s116_s29 + $0x18] sm:$0xff]  ;;  %v148_v3 = vld [vmem:[%s116_s29 + $0x28] sm:$0xff]  ;;  %v155_v4 = vsel %vm149_vm2, %v144_v1, 0.0 }
  0x3a   : > { %135 = vst [vmem:[#allocation2] sm:$0x3] %v617_v0  ;;  %138 = vst.msk [vmem:[#allocation2 + $0x2] sm:$0xff] %vm137_vm0, %v617_v0  ;;  %v156_v5 = vsel %vm149_vm2, %v146_v2, 0.0  ;;  %v158_v6 = vsel %vm149_vm2, %v148_v3, 0.0  ;;  %v143_v7 = vld [vmem:[%s116_s29] sm:$0xff] }
  0x3b   : > { %142 = vst.msk [vmem:[#allocation2 + $0xa] sm:$0xff] %vm140_vm1, %v617_v0  ;;  %141 = vst.msk [vmem:[#allocation2 + $0x2] sm:$0xff] %vm140_vm1, %v617_v0  ;;  %v145_v8 = vld [vmem:[%s116_s29 + $0x10] sm:$0xff]  ;;  %v147_v9 = vld [vmem:[%s116_s29 + $0x20] sm:$0xff]  ;;  %v157_v10 = vadd.f32 %v156_v5, %v155_v4  ;;  %v150_v11 = vsel %vm149_vm2, %v143_v7, 0.0  ;;  %s618_s16 = smov 1  }
  0x3c   : > { %v151_v12 = vsel %vm149_vm2, %v145_v8, 0.0  ;;  %v153_v13 = vsel %vm149_vm2, %v147_v9, 0.0  ;;  %s619_s24 = smov 127   ;;  %s620_s25 = smov 2   ;;  %vm344_vm3 = vcmask 130050   ;;  %vm347_vm4 = vcmask 123904  }
  0x3d   : > { %v152_v14 = vadd.f32 %v151_v12, %v150_v11  ;;  %v159_v15 = vadd.f32 %v158_v6, %v157_v10  ;;  %s621_s27 = smov 126   ;;  %vm234_vm5 = vcmask 1045504   ;;  %vm252_vm6 = vcmask 1046528   ;;  %s768_s28 = scalar_lea.vmem [#allocation6], %s459_s23 }
  0x3e   : > { %vm328_vm7 = vcmask 122880   ;;  %vm325_vm8 = vcmask 130049   ;;  %vm270_vm9 = vcmask 1043456   ;;  %vm292_vm10 = vcmask 1044480   ;;  %s460_s30 = smul.u32 768, %s656_s10  ;;  %s363_s2 = sshll.u32 %s768_s28, 4  ;;  %s810_s2 = int_to_ptr.vmem [resolvable:$true] %s363_s2 }
  0x3f   : > { %v154_v16 = vadd.f32 %v153_v13, %v152_v14  ;;  %161 = vst.msk [vmem:[#allocation2 + $0xa] sm:$0xff] %vm149_vm2, %v159_v15  ;;  %s350_s10 = scalar_lea.sflag [#allocation5], %s733_s22  ;;  %s546_s11 = scalar_lea.vmem %s810_s2, 768 }
  0x40   : > { %s808_s5 = scalar_lea.hbm %s859_s1, %s460_s30  ;;  %p547_p6 = scmp.ne.s32.totalorder %s810_s2, %s546_s11 }
  0x41   : > { %160 = vst.msk [vmem:[#allocation2 + $0x2] sm:$0xff] %vm149_vm2, %v154_v16  ;;  %p865_p11 = scmp.ne.s32.totalorder %s862_s17, 0  ;;  %s622_s13 = smov [#allocation6]  }
  0x42   : > { %s550_s14 = sshll.u32 %s622_s13, 4  ;;  %s551_s14 = int_to_ptr.vmem [resolvable:$false] %s550_s14 }
  0x43   : > { %p548_p12 = pnand %p547_p6, %p865_p11  ;;  %s552_s19 = scalar_lea.vmem %s551_s14, 1536 }
  0x44   : > { %p553_p8 = scmp.lt.s32.totalorder %s810_s2, %s551_s14  ;;  %p554_p10 = scmp.lt.s32.totalorder %s552_s19, %s546_s11 }
  0x45   : > { %p549_p13 = pneg %p548_p12 }
  0x46   : > { %v164_v17 = vld [vmem:[#allocation2 + $0x10] sm:$0xf]  ;;  %p555_p0 = por %p554_p10, %p553_p8 }
  0x47   : > { %184 = vrot.lane.b32.xlu1 %v164_v17, %s618_s16  ;;  %v754_v27 = vadd.f32 %v164_v17, %v164_v17 }
  0x48   : > { %v162_v18 = vld [vmem:[#allocation2] sm:$0xff]  ;;  %v163_v19 = vld [vmem:[#allocation2 + $0x8] sm:$0xff]  ;;  %p556_p2 = pnand %p555_p0, %p549_p13 }
  0x49   : > { %180 = vrot.lane.b32.xlu0 %v162_v18, %s618_s16  ;;  %v751_v22 = vadd.f32 %v162_v18, %v162_v18  ;;  %v756_v29 = vadd.f32 %v163_v19, %v163_v19 }
  0x4b   : > { %186 = vrot.lane.b32.xlu1 %v162_v18, %s619_s24  ;;  %v219_v6 = vmul.f32 4.0, %v751_v22 }
  0x4d   : > { %182 = vrot.lane.b32.xlu0 %v163_v19, %s618_s16 }
  0x4f   : > { %190 = vrot.lane.b32.xlu1 %v164_v17, %s619_s24 }
  0x51   : > { %188 = vrot.lane.b32.xlu0 %v163_v19, %s619_s24 }
  0x53   : > { %167 = vrot.lane.b32.xlu1 %v163_v19, %s620_s25 }
  0x55   : > { %165 = vrot.lane.b32.xlu0 %v162_v18, %s620_s25 }
  0x57   : > { %171 = vrot.lane.b32.xlu1 %v162_v18, %s621_s27 }
  0x59   : > { %169 = vrot.lane.b32.xlu0 %v164_v17, %s620_s25 }
  0x5b   : > { %175 = vrot.lane.b32.xlu1 %v164_v17, %s621_s27 }
  0x5d   : > { %173 = vrot.lane.b32.xlu0 %v163_v19, %s621_s27 }
  0xb9   : > { %v185_v20 = vpop.permute.xlu1 %184 }
  0xbb   : > { %v181_v21 = vpop.permute.xlu0 %180 }
  0xbd   : > { %v187_v23 = vpop.permute.xlu1 %186 }
  0xbe   : > { %v192_v24 = vadd.f32 %v187_v23, %v181_v21 }
  0xbf   : > { %v183_v25 = vpop.permute.xlu0 %182 }
  0xc0   : > { %v198_v26 = vsub.f32 %v751_v22, %v192_v24  ;;  %v201_v43 = vadd.f32 %v192_v24, %v192_v24  ;;  %v213_v4 = vmul.f32 6.0, %v192_v24 }
  0xc1   : > { %v191_v28 = vpop.permute.xlu1 %190 }
  0xc2   : > { %v316_v30 = vmul.f32 -0.5, %v198_v26  ;;  %v758_v31 = vadd.f32 %v191_v28, %v185_v20  ;;  %v246_v34 = vmul.f32 2.0, %v198_v26  ;;  %v235_v44 = vrot.slane %v198_v26, 2 }
  0xc3   : > { %v189_v32 = vpop.permute.xlu0 %188  ;;  %v221_v20 = vmul.f32 4.0, %v754_v27 }
  0xc4   : > { %v760_v33 = vadd.f32 %v189_v32, %v183_v25  ;;  %v448_v35 = vclamps-f32 %v316_v30, 3.0  ;;  %v200_v36 = vsub.f32 %v754_v27, %v758_v31  ;;  %v253_v48 = vrot.slane %v246_v34, 1 }
  0xc5   : > { %v168_v38 = vpop.permute.xlu1 %167  ;;  %v203_v11 = vadd.f32 %v758_v31, %v758_v31  ;;  %v220_v30 = vmul.f32 4.0, %v756_v29 }
  0xc6   : > { %v199_v37 = vsub.f32 %v756_v29, %v760_v33  ;;  %451 = vst.msk [vmem:[%s768_s28 + $0x1e] sm:$0xfc] %vm344_vm3, %v448_v35  ;;  %v238_v39 = vrot.slane %v200_v36, 2  ;;  %v248_v40 = vmul.f32 2.0, %v200_v36  ;;  %v318_v41 = vmul.f32 -0.5, %v200_v36 }
  0xc7   : > { %v166_v42 = vpop.permute.xlu0 %165  ;;  %v202_v15 = vadd.f32 %v760_v33, %v760_v33  ;;  %v214_v28 = vmul.f32 6.0, %v760_v33 }
  0xc8   : > { %v236_v45 = vrot.slane %v199_v37, 2  ;;  %v247_v46 = vmul.f32 2.0, %v199_v37  ;;  %v317_v47 = vmul.f32 -0.5, %v199_v37  ;;  %v245_v49 = vadd.f32 %v238_v39, %v200_v36 }
  0xc9   : > { %v256_v50 = vrot.slane %v248_v40, 1  ;;  %v450_v51 = vclamps-f32 %v318_v41, 3.0  ;;  %v172_v56 = vpop.permute.xlu1 %171 }
  0xca   : > { %v237_v52 = vsel %vm234_vm5, %v235_v44, %v236_v45  ;;  %v239_v53 = vsel %vm234_vm5, %v236_v45, %v238_v39  ;;  %v254_v54 = vrot.slane %v247_v46, 1  ;;  %v449_v55 = vclamps-f32 %v317_v47, 3.0 }
  0xcb   : > { %v263_v57 = vsub.f32 %v245_v49, %v256_v50  ;;  %453 = vst.msk [vmem:[%s768_s28 + $0x2e] sm:$0x3] %vm347_vm4, %v450_v51  ;;  %v243_v58 = vadd.f32 %v237_v52, %v198_v26  ;;  %v244_v59 = vadd.f32 %v239_v53, %v199_v37  ;;  %v177_v60 = vadd.f32 %v172_v56, %v166_v42  ;;  %v170_v61 = vpop.permute.xlu0 %169 }
  0xcc   : > { %v255_v62 = vsel %vm252_vm6, %v253_v48, %v254_v54  ;;  %v257_v63 = vsel %vm252_vm6, %v254_v54, %v256_v50  ;;  %452 = vst.msk [vmem:[%s768_s28 + $0x26] sm:$0xff] %vm149_vm2, %v449_v55  ;;  %v215_v26 = vmul.f32 6.0, %v758_v31 }
  0xcd   : > { %v266_v0 = vmul.f32 0.25, %v263_v57  ;;  %v261_v1 = vsub.f32 %v243_v58, %v255_v62  ;;  %v262_v2 = vsub.f32 %v244_v59, %v257_v63  ;;  %v204_v3 = vsub.f32 %v201_v43, %v177_v60  ;;  %v176_v7 = vpop.permute.xlu1 %175 }
  0xce   : > { %v210_v5 = vmul.f32 2.0, %v177_v60  ;;  %v179_v14 = vadd.f32 %v176_v7, %v170_v61 }
  0xcf   : > { %v443_v8 = vclamps-f32 %v266_v0, 3.0  ;;  %v264_v9 = vmul.f32 0.25, %v261_v1  ;;  %v265_v10 = vmul.f32 0.25, %v262_v2  ;;  %v174_v12 = vpop.permute.xlu0 %173  ;;  %v207_v19 = vsub.f32 %v204_v3, %v751_v22 }
  0xd0   : > { %v216_v13 = vsub.f32 %v210_v5, %v213_v4  ;;  %v178_v16 = vadd.f32 %v174_v12, %v168_v38  ;;  %v206_v23 = vsub.f32 %v203_v11, %v179_v14  ;;  %v212_v24 = vmul.f32 2.0, %v179_v14 }
  0xd1   : > { %329 = vst.msk [vmem:[%s768_s28 + $0xf] sm:$0x1] %vm328_vm7, %v443_v8  ;;  %v441_v17 = vclamps-f32 %v264_v9, 3.0  ;;  %v442_v18 = vclamps-f32 %v265_v10, 3.0  ;;  %v271_v41 = vrot.slane %v207_v19, 4 }
  0xd2   : > { %v222_v21 = vadd.f32 %v219_v6, %v216_v13  ;;  %v205_v25 = vsub.f32 %v202_v15, %v178_v16  ;;  %v211_v32 = vmul.f32 2.0, %v178_v16  ;;  %v209_v22 = vsub.f32 %v206_v23, %v754_v27 }
  0xd3   : > { %326 = vst.msk [vmem:[%s768_s28 - $0x1] sm:$0xfe] %vm325_vm8, %v441_v17  ;;  %v218_v35 = vsub.f32 %v212_v24, %v215_v26 }
  0xd4   : > { %327 = vst.msk [vmem:[%s768_s28 + $0x7] sm:$0xff] %vm149_vm2, %v442_v18  ;;  %v225_v34 = vadd.f32 %v222_v21, %v207_v19  ;;  %v208_v36 = vsub.f32 %v205_v25, %v756_v29  ;;  %v217_v37 = vsub.f32 %v211_v32, %v214_v28  ;;  %v274_v39 = vrot.slane %v209_v22, 4 }
  0xd5   : > { %v224_v31 = vadd.f32 %v221_v20, %v218_v35  ;;  %v283_v42 = vrot.slane %v222_v21, 1  ;;  %v293_v43 = vrot.slane %v222_v21, 3 }
  0xd6   : > { %v228_v38 = vmul.f32 -2.0, %v225_v34  ;;  %v223_v33 = vadd.f32 %v220_v30, %v217_v37  ;;  %v272_v40 = vrot.slane %v208_v36, 4 }
  0xd7   : > { %v227_v45 = vadd.f32 %v224_v31, %v209_v22  ;;  %v286_v46 = vrot.slane %v224_v31, 1  ;;  %v296_v47 = vrot.slane %v224_v31, 3 }
  0xd8   : > { %v305_v44 = vrot.slane %v228_v38, 2  ;;  %v226_v48 = vadd.f32 %v223_v33, %v208_v36  ;;  %v273_v27 = vsel %vm270_vm9, %v271_v41, %v272_v40  ;;  %v275_v49 = vsel %vm270_vm9, %v272_v40, %v274_v39 }
  0xd9   : > { %v284_v50 = vrot.slane %v223_v33, 1  ;;  %v294_v29 = vrot.slane %v223_v33, 3  ;;  %v230_v51 = vmul.f32 -2.0, %v227_v45  ;;  %v278_v53 = vadd.f32 %v273_v27, %v207_v19 }
  0xda   : > { %v229_v52 = vmul.f32 -2.0, %v226_v48  ;;  %v279_v54 = vadd.f32 %v275_v49, %v208_v36 }
  0xdb   : > { %v285_v55 = vsel %vm252_vm6, %v283_v42, %v284_v50  ;;  %v287_v56 = vsel %vm252_vm6, %v284_v50, %v286_v46  ;;  %v295_v57 = vsel %vm292_vm10, %v293_v43, %v294_v29  ;;  %v297_v58 = vsel %vm292_vm10, %v294_v29, %v296_v47 }
  0xdc   : > { %v308_v59 = vrot.slane %v230_v51, 2  ;;  %v290_v60 = vadd.f32 %v285_v55, %v278_v53  ;;  %v291_v61 = vadd.f32 %v287_v56, %v279_v54  ;;  %v306_v62 = vrot.slane %v229_v52, 2 }
  0xde   : > { %v300_v63 = vadd.f32 %v295_v57, %v290_v60  ;;  %v301_v0 = vadd.f32 %v297_v58, %v291_v61  ;;  %v307_v1 = vsel %vm234_vm5, %v305_v44, %v306_v62  ;;  %v309_v2 = vsel %vm234_vm5, %v306_v62, %v308_v59 }
  0xe0   : > { %v312_v3 = vadd.f32 %v307_v1, %v300_v63  ;;  %v313_v4 = vadd.f32 %v309_v2, %v301_v0 }
  0xe2   : > { %v314_v5 = vmul.f32 0.083333336, %v312_v3  ;;  %v315_v6 = vmul.f32 0.083333336, %v313_v4 }
  0xe4   : > { %v444_v7 = vclamps-f32 %v314_v5, 3.0  ;;  %v445_v8 = vclamps-f32 %v315_v6, 3.0 }
  0xe6   : > { %446 = vst.msk [vmem:[%s768_s28 + $0x10] sm:$0xff] %vm149_vm2, %v444_v7  ;;  %447 = vst.msk [vmem:[%s768_s28 + $0x18] sm:$0xff] %vm149_vm2, %v445_v8 }
  0xe7   : > { %559 = shalt.err (!%p556_p2)
}
  0xe8   : > { %s560_s20 = scalar_lea.hbm %s808_s5, 768  ;;  %s564_s26 = scalar_lea.hbm %s859_s1, 1536 }
  0xe9   : > { %p561_p4 = scmp.ne.s32.totalorder %s808_s5, %s560_s20  ;;  %p565_p9 = scmp.lt.u32.totalorder %s808_s5, %s859_s1 }
  0xea   : > { %p566_p1 = scmp.lt.u32.totalorder %s564_s26, %s560_s20  ;;  %p568_p6 = scmp.lt.u32.totalorder %s560_s20, %s808_s5 }
  0xeb   : > { %p562_p5 = pnand %p561_p4, %p865_p11 }
  0xec   : > { %p567_p3 = por %p566_p1, %p565_p9 }
  0xed   : > { %p563_p7 = pneg %p562_p5 }
  0xee   : > { %p569_p12 = por %p568_p6, %p567_p3 }
  0xf0   : > { %p570_p13 = pnand %p569_p12, %p563_p7 }
  0xf2   : > { %573 = shalt.err (!%p570_p13)
}
  0xf3   : > { %s623_s24 = smov 128   ;;  %s624_s25 = smov 8  }
  0xf4   : > { %463 = dma.vmem_to_hbm [thread:$0]  (%p865_p11), %s810_s2, 768, %s808_s5, %s350_s10, %s623_s24, %s623_s24, %s624_s25  }
  0xf5 PF: > { %s378_s27 = sand.u32 1, %s600_s6   ;;  %p866_p8 = scmp.ne.s32.totalorder %s863_s18, 0 }
  0xf6   : > { %p867_p10 = scmp.ge.s32.totalorder %s612_s9, 2  ;;  %s379_s28 = scalar_lea.sflag [#allocation5], %s378_s27 }
  0xf8   : > { %p470_p0 = pnand %p867_p10, %p866_p8 }
  0xfa   : > { %595 = dma.done.wait (!%p470_p0), %s379_s28, 768  }
  0xfb   : > { %597 = vsyncadd (!%p470_p0), %s379_s28, 4294966528  ;;  %p14_p2 = scmp.ge.s32.totalorder %s660_s12, 4   ;;  %s868_s6 = smov %s604_s7 }
  0xfc   : > { %s869_s7 = smov %s608_s8  ;;  %s870_s8 = smov %s672_s15 }
  0xfd   : > { %s871_s9 = smov %s660_s12  ;;  %16 = sbr.rel (!%p14_p2) target bundleno = 5 (0x5), region = 71 }
 0x104   :  { %384 = vsyncpa [#allocation4], 1 }
 0x105   :  { %386 = vsyncpa [#allocation4 + $0x1], 1 }
 0x106   :  { %387 = vsyncpa [#allocation5], 1 }
 0x107   :  { %389 = vsyncpa [#allocation5 + $0x1], 1 }

</bundles_post_ra>
